<compile_context>
chip_gen: v7x
topology: tpu7x:2x2x1
jax: 0.10.0
libtpu: 0.0.40
codegen_flags: <defaults>
</compile_context>

<pallas_src>
import functools

import jax
import jax.numpy as jnp
from jax import lax
from jax.experimental import pallas as pl
from jax.experimental.pallas import tpu as pltpu

EPS = 1e-5          # nn.InstanceNorm2d default eps
NEG_SLOPE = 0.2     # LeakyReLU(0.2)


def _round_up(x, m):
    return (x + m - 1) // m * m


def _block_kernel(patches_ref, w_ref, gamma_ref, beta_ref, out_ref,
                  y_ref, sum_ref, ssq_ref, scale_ref, shift_ref, *, inv_p):
    # patches_ref: (1, P_TILE, K_pad) bf16     w_ref: (K_pad, C_TILE) bf16
    # gamma/beta : (1, C_TILE) f32             out_ref: (1, P_TILE, C_TILE)
    # y_ref      : (T, P_TILE, C_TILE) stash of the raw conv result
    # sum/ssq    : (1, C_TILE) f32 running per-channel stats
    # scale/shift: (1, C_TILE) f32 fused affine, computed once per (n, c)
    phase = pl.program_id(2)
    t = pl.program_id(3)

    # ---- phase 0: conv tile on the MXU (once), stash it, accumulate stats ----
    @pl.when(phase == 0)
    def _():
        @pl.when(t == 0)
        def _():
            sum_ref[...] = jnp.zeros_like(sum_ref)
            ssq_ref[...] = jnp.zeros_like(ssq_ref)

        y = jnp.dot(patches_ref[0], w_ref[...],
                    preferred_element_type=jnp.float32)       # (P_TILE, C_TILE) f32
        y_ref[t] = y.astype(y_ref.dtype)
        sum_ref[...] += jnp.sum(y, axis=0, keepdims=True)
        ssq_ref[...] += jnp.sum(y * y, axis=0, keepdims=True)

    # ---- phase 1: epilogue only (no MXU recompute, no patches re-read) ----
    @pl.when(phase == 1)
    def _():
        @pl.when(t == 0)
        def _():
            mean = sum_ref[...] * inv_p                        # (1, C_TILE)
            var = jnp.maximum(ssq_ref[...] * inv_p - mean * mean, 0.0)
            scale = gamma_ref[...] * lax.rsqrt(var + EPS)
            scale_ref[...] = scale
            shift_ref[...] = beta_ref[...] - mean * scale

        z = y_ref[t].astype(jnp.float32) * scale_ref[...] + shift_ref[...]
        out_ref[0] = jnp.maximum(z, NEG_SLOPE * z).astype(out_ref.dtype)


def block_forward(x, weight, bias, gamma, beta, stride=1, *,
                  p_tile=512, c_tile=256, stash_dtype=jnp.float32,
                  out_dtype=None, channels_last_out=False):
    """x: (N, C_in, H, W) NCHW.  weight: (C_out, C_in, 4, 4) OIHW (PyTorch)."""
    del bias  # exactly cancelled by InstanceNorm mean subtraction
    N, C_in, H, W = x.shape
    C_out = weight.shape[0]
    KH = KW = 4
    H_out = (H + 2 - KH) // stride + 1
    W_out = (W + 2 - KW) // stride + 1
    P = H_out * W_out
    K = C_in * KH * KW
    out_dtype = x.dtype if out_dtype is None else out_dtype

    # im2col built directly in (N, P, K) channels-last order: one NCHW->NHWC
    # transpose (16x smaller than transposing the patches tensor) plus a tap
    # concat along the lane axis; no (N,K,P)->(N,P,K) HBM transpose pass.
    # TODO(synk): replace wrapper-side im2col with in-kernel tap accumulation
    # (stream raw NHWC blocks + 16 shifted-slice matmuls over raw input).
    x_nhwc = jnp.transpose(x, (0, 2, 3, 1))
    x_pad = jnp.pad(x_nhwc, ((0, 0), (1, 1), (1, 1), (0, 0)), mode="reflect")
    taps = []
    for kh in range(KH):
        for kw in range(KW):
            taps.append(x_pad[:, kh:kh + stride * H_out:stride,
                              kw:kw + stride * W_out:stride, :])
    patches = jnp.concatenate(taps, axis=-1).reshape(N, P, K)  # tap-major, C_in-minor

    # --- lane-dense, MXU-friendly padding / tiling ---
    P_TILE = min(_round_up(p_tile, 16), _round_up(P, 16))      # multiple of 16
    P_pad = _round_up(P, P_TILE)
    K_pad = _round_up(K, 128)
    C_pad = _round_up(C_out, 128)                              # lane-dense output
    C_TILE = min(_round_up(c_tile, 128), C_pad)
    num_p_tiles = P_pad // P_TILE
    num_c_tiles = C_pad // C_TILE
    T = num_p_tiles

    # Zero-padded P rows / K cols contribute exactly 0 to sum & sum-of-squares
    # (no bias), so the true 1/P normalizer keeps the stats exact.
    patches = jnp.pad(patches, ((0, 0), (0, P_pad - P), (0, K_pad - K)))
    patches = patches.astype(jnp.bfloat16)

    # weight OIHW -> (KH, KW, C_in, C_out) -> (K, C_out): matches the
    # tap-major / C_in-minor K order of the patches.
    w2d = jnp.transpose(weight, (2, 3, 1, 0)).reshape(K, C_out)
    w2d = jnp.pad(w2d, ((0, K_pad - K), (0, C_pad - C_out))).astype(jnp.bfloat16)
    g2d = jnp.pad(gamma.reshape(1, C_out).astype(jnp.float32),
                  ((0, 0), (0, C_pad - C_out)))
    be2d = jnp.pad(beta.reshape(1, C_out).astype(jnp.float32),
                   ((0, 0), (0, C_pad - C_out)))

    # Grid-invariant weight block: single-buffer it when it is big (deep layers)
    # so it does not crowd v7x's 64 MiB VMEM; keep default double-buffering for
    # small weights.
    w_spec_kwargs = {}
    if K_pad * C_TILE * 2 > (2 << 20):
        w_spec_kwargs = dict(pipeline_mode=pl.Buffered(1))

    kernel = functools.partial(_block_kernel, inv_p=float(1.0 / P))

    out = pl.pallas_call(
        kernel,
        out_shape=jax.ShapeDtypeStruct((N, P_pad, C_pad), out_dtype),
        grid=(N, num_c_tiles, 2, num_p_tiles),                 # (batch, Cout tile, phase, P tile)
        in_specs=[
            # Phase 0 streams the P tiles; phase 1 parks on the last-fetched
            # tile so the epilogue re-reads nothing from HBM.
            pl.BlockSpec((1, P_TILE, K_pad),
                         lambda n, c, ph, t: (n, (1 - ph) * t + ph * (T - 1), 0)),
            pl.BlockSpec((K_pad, C_TILE), lambda n, c, ph, t: (0, c),
                         **w_spec_kwargs),
            pl.BlockSpec((1, C_TILE), lambda n, c, ph, t: (0, c)),
            pl.BlockSpec((1, C_TILE), lambda n, c, ph, t: (0, c)),
        ],
        # Phase 0 parks the output on block (n, 0, c); nothing is written there
        # until phase 1 / t == 0 revisits the still-resident block and
        # overwrites it, so there are no garbage / duplicate output writebacks.
        out_specs=pl.BlockSpec((1, P_TILE, C_TILE),
                               lambda n, c, ph, t: (n, ph * t, c)),
        scratch_shapes=[
            pltpu.VMEM((num_p_tiles, P_TILE, C_TILE), stash_dtype),  # raw conv stash
            pltpu.VMEM((1, C_TILE), jnp.float32),                    # per-channel sum
            pltpu.VMEM((1, C_TILE), jnp.float32),                    # per-channel sum(y^2)
            pltpu.VMEM((1, C_TILE), jnp.float32),                    # fused scale
            pltpu.VMEM((1, C_TILE), jnp.float32),                    # fused shift
        ],
        compiler_params=pltpu.CompilerParams(
            dimension_semantics=("parallel", "parallel", "arbitrary", "arbitrary"),
            vmem_limit_bytes=64 * 1024 * 1024),
    )(patches, w2d, g2d, be2d)

    out = out[:, :P, :C_out]                      # strip padding -> (N, P, C_out)
    if channels_last_out:
        return out.reshape(N, H_out, W_out, C_out)
    return out.transpose(0, 2, 1).reshape(N, C_out, H_out, W_out)


def block_reference(x, weight, bias, gamma, beta, stride):
    """Pure-JAX reference (full PyTorch semantics, incl. the conv bias)."""
    x_pad = jnp.pad(x, ((0, 0), (0, 0), (1, 1), (1, 1)), mode="reflect")
    y = lax.conv_general_dilated(
        x_pad, weight, (stride, stride), "VALID",
        dimension_numbers=("NCHW", "OIHW", "NCHW"))
    y = y + bias[None, :, None, None]
    mean = y.mean(axis=(2, 3), keepdims=True)
    var = ((y - mean) ** 2).mean(axis=(2, 3), keepdims=True)
    y = (y - mean) * lax.rsqrt(var + EPS)
    y = y * gamma[None, :, None, None] + beta[None, :, None, None]
    return jnp.where(y >= 0, y, NEG_SLOPE * y)


if __name__ == "__main__":
    key = jax.random.PRNGKey(0)
    k_x, k_w, k_b, k_g, k_be = jax.random.split(key, 5)

    # --- test 1: stride-2 block, multiple P tiles, f32 NCHW output ---
    N, C_in, C_out, H, W = 2, 4, 8, 16, 16
    stride = 2
    x = jax.random.normal(k_x, (N, C_in, H, W), dtype=jnp.float32)
    weight = 0.1 * jax.random.normal(k_w, (C_out, C_in, 4, 4), dtype=jnp.float32)
    bias = 0.05 * jax.random.normal(k_b, (C_out,), dtype=jnp.float32)
    gamma = 1.0 + 0.1 * jax.random.normal(k_g, (C_out,), dtype=jnp.float32)
    beta = 0.05 * jax.random.normal(k_be, (C_out,), dtype=jnp.float32)

    # p_tile=32 -> P=64 split into 2 spatial tiles, exercising the two-phase norm.
    out = block_forward(x, weight, bias, gamma, beta, stride=stride, p_tile=32)
    out = jax.block_until_ready(out)
    ref = jax.block_until_ready(block_reference(x, weight, bias, gamma, beta, stride))
    assert out.shape == ref.shape == (N, C_out, 8, 8), out.shape
    err = float(jnp.abs(out - ref).max())
    assert err < 3e-2, err

    # --- test 1b: bf16 / channels-last output path (for chaining Blocks) ---
    out_cl = block_forward(x, weight, bias, gamma, beta, stride=stride, p_tile=32,
                           out_dtype=jnp.bfloat16, channels_last_out=True)
    out_cl = jax.block_until_ready(out_cl)
    assert out_cl.shape == (N, 8, 8, C_out), out_cl.shape
    err_cl = float(jnp.abs(out_cl.astype(jnp.float32)
                           - ref.transpose(0, 2, 3, 1)).max())
    assert err_cl < 1e-1, err_cl

    # --- test 2: stride-1 block with two C_out tiles (channel-parallel axis) ---
    k2 = jax.random.PRNGKey(1)
    k_x2, k_w2, k_b2, k_g2, k_be2 = jax.random.split(k2, 5)
    N2, C_in2, C_out2, H2, W2 = 1, 4, 192, 8, 8
    x2 = jax.random.normal(k_x2, (N2, C_in2, H2, W2), dtype=jnp.float32)
    w2 = 0.1 * jax.random.normal(k_w2, (C_out2, C_in2, 4, 4), dtype=jnp.float32)
    b2 = 0.05 * jax.random.normal(k_b2, (C_out2,), dtype=jnp.float32)
    g2 = 1.0 + 0.1 * jax.random.normal(k_g2, (C_out2,), dtype=jnp.float32)
    be2 = 0.05 * jax.random.normal(k_be2, (C_out2,), dtype=jnp.float32)

    out2 = block_forward(x2, w2, b2, g2, be2, stride=1, c_tile=128)
    out2 = jax.block_until_ready(out2)
    ref2 = jax.block_until_ready(block_reference(x2, w2, b2, g2, be2, 1))
    assert out2.shape == ref2.shape == (N2, C_out2, 7, 7), out2.shape
    err2 = float(jnp.abs(out2 - ref2).max())
    assert err2 < 3e-2, err2

    print("KERNEL_OK")
</pallas_src>

<mosaic_0001>
module attributes {stable_mosaic.version = 11 : i64} {
  func.func @_block_kernel(%arg0: i32, %arg1: i32, %arg2: i32, %arg3: i32, %arg4: memref<1x32x128xbf16, #tpu.memory_space<vmem>>, %arg5: memref<128x128xbf16, #tpu.memory_space<vmem>>, %arg6: memref<1x128xf32, #tpu.memory_space<vmem>>, %arg7: memref<1x128xf32, #tpu.memory_space<vmem>>, %arg8: memref<1x32x128xf32, #tpu.memory_space<vmem>>, %arg9: memref<2x32x128xf32, #tpu.memory_space<vmem>>, %arg10: memref<1x128xf32, #tpu.memory_space<vmem>>, %arg11: memref<1x128xf32, #tpu.memory_space<vmem>>, %arg12: memref<1x128xf32, #tpu.memory_space<vmem>>, %arg13: memref<1x128xf32, #tpu.memory_space<vmem>>) attributes {dimension_semantics = [#tpu.dimension_semantics<parallel>, #tpu.dimension_semantics<parallel>, #tpu.dimension_semantics<arbitrary>, #tpu.dimension_semantics<arbitrary>], iteration_bounds = array<i64: 2, 1, 2, 2>, scalar_prefetch = 0 : i64, scratch_operands = 5 : i64, tpu.core_type = #tpu.core_type<tc>, window_params = [{transform_indices = @transform_0, window_bounds = array<i64: 1, 32, 128>}, {transform_indices = @transform_1, window_bounds = array<i64: 128, 128>}, {transform_indices = @transform_2, window_bounds = array<i64: 1, 128>}, {transform_indices = @transform_3, window_bounds = array<i64: 1, 128>}, {transform_indices = @transform_4, window_bounds = array<i64: 1, 32, 128>}]} {
    %c0_i32 = arith.constant 0 : i32
    %0 = arith.cmpi eq, %arg2, %c0_i32 : i32
    %1 = arith.extui %0 : i1 to i32
    %c0_i32_0 = arith.constant 0 : i32
    %2 = arith.cmpi ne, %1, %c0_i32_0 : i32
    scf.if %2 {
      %c0_i32_2 = arith.constant 0 : i32
      %6 = arith.cmpi eq, %arg3, %c0_i32_2 : i32
      %7 = arith.extui %6 : i1 to i32
      %c0_i32_3 = arith.constant 0 : i32
      %8 = arith.cmpi ne, %7, %c0_i32_3 : i32
      scf.if %8 {
        %cst_20 = arith.constant 0.000000e+00 : f32
        %28 = vector.broadcast %cst_20 : f32 to vector<1x128xf32>
        %c0_21 = arith.constant 0 : index
        %c0_22 = arith.constant 0 : index
        %29 = vector.load %arg10[%c0_21, %c0_22] : memref<1x128xf32, #tpu.memory_space<vmem>>, vector<1x128xf32>
        tpu.vector_store %arg10[%c0_21, %c0_22], %28 {strides = array<i32>} : memref<1x128xf32, #tpu.memory_space<vmem>>, vector<1x128xf32>,
        %cst_23 = arith.constant 0.000000e+00 : f32
        %30 = vector.broadcast %cst_23 : f32 to vector<1x128xf32>
        %c0_24 = arith.constant 0 : index
        %c0_25 = arith.constant 0 : index
        %31 = vector.load %arg11[%c0_24, %c0_25] : memref<1x128xf32, #tpu.memory_space<vmem>>, vector<1x128xf32>
        tpu.vector_store %arg11[%c0_24, %c0_25], %30 {strides = array<i32>} : memref<1x128xf32, #tpu.memory_space<vmem>>, vector<1x128xf32>,
      } else {
      }
      %c0 = arith.constant 0 : index
      %c0_4 = arith.constant 0 : index
      %c0_5 = arith.constant 0 : index
      %9 = vector.load %arg4[%c0, %c0_4, %c0_5] : memref<1x32x128xbf16, #tpu.memory_space<vmem>>, vector<1x32x128xbf16>
      %10 = vector.shape_cast %9 : vector<1x32x128xbf16> to vector<32x128xbf16>
      %c0_6 = arith.constant 0 : index
      %c0_7 = arith.constant 0 : index
      %11 = vector.load %arg5[%c0_6, %c0_7] : memref<128x128xbf16, #tpu.memory_space<vmem>>, vector<128x128xbf16>
      %cst = arith.constant dense<0.000000e+00> : vector<32x128xf32>
      %12 = tpu.matmul %10, %11, %cst {dimension_numbers = #tpu.dot_dimension_numbers<[1], [0], [0], [1], [0, 0, 1, 1], [], []>} : vector<32x128xbf16>, vector<128x128xbf16>, vector<32x128xf32> -> vector<32x128xf32>
      %13 = arith.index_cast %arg3 : i32 to index
      %c0_8 = arith.constant 0 : index
      %c0_9 = arith.constant 0 : index
      %14 = vector.load %arg9[%13, %c0_8, %c0_9] : memref<2x32x128xf32, #tpu.memory_space<vmem>>, vector<1x32x128xf32>
      %15 = vector.shape_cast %14 : vector<1x32x128xf32> to vector<32x128xf32>
      %16 = vector.shape_cast %12 : vector<32x128xf32> to vector<1x32x128xf32>
      tpu.vector_store %arg9[%13, %c0_8, %c0_9], %16 {strides = array<i32>} : memref<2x32x128xf32, #tpu.memory_space<vmem>>, vector<1x32x128xf32>,
      %c0_10 = arith.constant 0 : index
      %c0_11 = arith.constant 0 : index
      %17 = vector.load %arg10[%c0_10, %c0_11] : memref<1x128xf32, #tpu.memory_space<vmem>>, vector<1x128xf32>
      %cst_12 = arith.constant dense<0.000000e+00> : vector<128xf32>
      %18 = vector.multi_reduction <add>, %12, %cst_12 [0] : vector<32x128xf32> to vector<128xf32>
      %19 = vector.shape_cast %18 : vector<128xf32> to vector<1x128xf32>
      %20 = arith.addf %17, %19 : vector<1x128xf32>
      %c0_13 = arith.constant 0 : index
      %c0_14 = arith.constant 0 : index
      %21 = vector.load %arg10[%c0_13, %c0_14] : memref<1x128xf32, #tpu.memory_space<vmem>>, vector<1x128xf32>
      tpu.vector_store %arg10[%c0_13, %c0_14], %20 {strides = array<i32>} : memref<1x128xf32, #tpu.memory_space<vmem>>, vector<1x128xf32>,
      %c0_15 = arith.constant 0 : index
      %c0_16 = arith.constant 0 : index
      %22 = vector.load %arg11[%c0_15, %c0_16] : memref<1x128xf32, #tpu.memory_space<vmem>>, vector<1x128xf32>
      %23 = arith.mulf %12, %12 : vector<32x128xf32>
      %cst_17 = arith.constant dense<0.000000e+00> : vector<128xf32>
      %24 = vector.multi_reduction <add>, %23, %cst_17 [0] : vector<32x128xf32> to vector<128xf32>
      %25 = vector.shape_cast %24 : vector<128xf32> to vector<1x128xf32>
      %26 = arith.addf %22, %25 : vector<1x128xf32>
      %c0_18 = arith.constant 0 : index
      %c0_19 = arith.constant 0 : index
      %27 = vector.load %arg11[%c0_18, %c0_19] : memref<1x128xf32, #tpu.memory_space<vmem>>, vector<1x128xf32>
      tpu.vector_store %arg11[%c0_18, %c0_19], %26 {strides = array<i32>} : memref<1x128xf32, #tpu.memory_space<vmem>>, vector<1x128xf32>,
    } else {
    }
    %c1_i32 = arith.constant 1 : i32
    %3 = arith.cmpi eq, %arg2, %c1_i32 : i32
    %4 = arith.extui %3 : i1 to i32
    %c0_i32_1 = arith.constant 0 : i32
    %5 = arith.cmpi ne, %4, %c0_i32_1 : i32
    scf.if %5 {
      %c0_i32_2 = arith.constant 0 : i32
      %6 = arith.cmpi eq, %arg3, %c0_i32_2 : i32
      %7 = arith.extui %6 : i1 to i32
      %c0_i32_3 = arith.constant 0 : i32
      %8 = arith.cmpi ne, %7, %c0_i32_3 : i32
      scf.if %8 {
        %c0_12 = arith.constant 0 : index
        %c0_13 = arith.constant 0 : index
        %24 = vector.load %arg10[%c0_12, %c0_13] : memref<1x128xf32, #tpu.memory_space<vmem>>, vector<1x128xf32>
        %cst_14 = arith.constant 1.562500e-02 : f32
        %25 = vector.broadcast %cst_14 : f32 to vector<1x128xf32>
        %26 = arith.mulf %24, %25 : vector<1x128xf32>
        %c0_15 = arith.constant 0 : index
        %c0_16 = arith.constant 0 : index
        %27 = vector.load %arg11[%c0_15, %c0_16] : memref<1x128xf32, #tpu.memory_space<vmem>>, vector<1x128xf32>
        %cst_17 = arith.constant 1.562500e-02 : f32
        %28 = vector.broadcast %cst_17 : f32 to vector<1x128xf32>
        %29 = arith.mulf %27, %28 : vector<1x128xf32>
        %30 = arith.mulf %26, %26 : vector<1x128xf32>
        %31 = arith.subf %29, %30 : vector<1x128xf32>
        %cst_18 = arith.constant 0.000000e+00 : f32
        %32 = vector.broadcast %cst_18 : f32 to vector<1x128xf32>
        %33 = arith.maximumf %31, %32 : vector<1x128xf32>
        %c0_19 = arith.constant 0 : index
        %c0_20 = arith.constant 0 : index
        %34 = vector.load %arg6[%c0_19, %c0_20] : memref<1x128xf32, #tpu.memory_space<vmem>>, vector<1x128xf32>
        %cst_21 = arith.constant 9.99999974E-6 : f32
        %35 = vector.broadcast %cst_21 : f32 to vector<1x128xf32>
        %36 = arith.addf %33, %35 : vector<1x128xf32>
        %37 = math.rsqrt %36 : vector<1x128xf32>
        %38 = arith.mulf %34, %37 : vector<1x128xf32>
        %c0_22 = arith.constant 0 : index
        %c0_23 = arith.constant 0 : index
        %39 = vector.load %arg12[%c0_22, %c0_23] : memref<1x128xf32, #tpu.memory_space<vmem>>, vector<1x128xf32>
        tpu.vector_store %arg12[%c0_22, %c0_23], %38 {strides = array<i32>} : memref<1x128xf32, #tpu.memory_space<vmem>>, vector<1x128xf32>,
        %c0_24 = arith.constant 0 : index
        %c0_25 = arith.constant 0 : index
        %40 = vector.load %arg7[%c0_24, %c0_25] : memref<1x128xf32, #tpu.memory_space<vmem>>, vector<1x128xf32>
        %41 = arith.mulf %26, %38 : vector<1x128xf32>
        %42 = arith.subf %40, %41 : vector<1x128xf32>
        %c0_26 = arith.constant 0 : index
        %c0_27 = arith.constant 0 : index
        %43 = vector.load %arg13[%c0_26, %c0_27] : memref<1x128xf32, #tpu.memory_space<vmem>>, vector<1x128xf32>
        tpu.vector_store %arg13[%c0_26, %c0_27], %42 {strides = array<i32>} : memref<1x128xf32, #tpu.memory_space<vmem>>, vector<1x128xf32>,
      } else {
      }
      %9 = arith.index_cast %arg3 : i32 to index
      %c0 = arith.constant 0 : index
      %c0_4 = arith.constant 0 : index
      %10 = vector.load %arg9[%9, %c0, %c0_4] : memref<2x32x128xf32, #tpu.memory_space<vmem>>, vector<1x32x128xf32>
      %11 = vector.shape_cast %10 : vector<1x32x128xf32> to vector<32x128xf32>
      %c0_5 = arith.constant 0 : index
      %c0_6 = arith.constant 0 : index
      %12 = vector.load %arg12[%c0_5, %c0_6] : memref<1x128xf32, #tpu.memory_space<vmem>>, vector<1x128xf32>
      %13 = vector.broadcast %12 : vector<1x128xf32> to vector<32x128xf32>
      %14 = arith.mulf %11, %13 : vector<32x128xf32>
      %c0_7 = arith.constant 0 : index
      %c0_8 = arith.constant 0 : index
      %15 = vector.load %arg13[%c0_7, %c0_8] : memref<1x128xf32, #tpu.memory_space<vmem>>, vector<1x128xf32>
      %16 = vector.broadcast %15 : vector<1x128xf32> to vector<32x128xf32>
      %17 = arith.addf %14, %16 : vector<32x128xf32>
      %cst = arith.constant 2.000000e-01 : f32
      %18 = vector.broadcast %cst : f32 to vector<32x128xf32>
      %19 = arith.mulf %18, %17 : vector<32x128xf32>
      %20 = arith.maximumf %17, %19 : vector<32x128xf32>
      %c0_9 = arith.constant 0 : index
      %c0_10 = arith.constant 0 : index
      %c0_11 = arith.constant 0 : index
      %21 = vector.load %arg8[%c0_9, %c0_10, %c0_11] : memref<1x32x128xf32, #tpu.memory_space<vmem>>, vector<1x32x128xf32>
      %22 = vector.shape_cast %21 : vector<1x32x128xf32> to vector<32x128xf32>
      %23 = vector.shape_cast %20 : vector<32x128xf32> to vector<1x32x128xf32>
      tpu.vector_store %arg8[%c0_9, %c0_10, %c0_11], %23 {strides = array<i32>} : memref<1x32x128xf32, #tpu.memory_space<vmem>>, vector<1x32x128xf32>,
    } else {
    }
    return
  }
  func.func @transform_0(%arg0: i32, %arg1: i32, %arg2: i32, %arg3: i32) -> (i32, i32, i32) {
    %c1_i32 = arith.constant 1 : i32
    %0 = arith.subi %c1_i32, %arg2 : i32
    %1 = arith.muli %0, %arg3 : i32
    %c1_i32_0 = arith.constant 1 : i32
    %2 = arith.muli %arg2, %c1_i32_0 : i32
    %3 = arith.addi %1, %2 : i32
    %c0_i32 = arith.constant 0 : i32
    %c0_i32_1 = arith.constant 0 : i32
    return %arg0, %3, %c0_i32 : i32, i32, i32
  }
  func.func @transform_1(%arg0: i32, %arg1: i32, %arg2: i32, %arg3: i32) -> (i32, i32) {
    %c0_i32 = arith.constant 0 : i32
    %c0_i32_0 = arith.constant 0 : i32
    return %c0_i32, %arg1 : i32, i32
  }
  func.func @transform_2(%arg0: i32, %arg1: i32, %arg2: i32, %arg3: i32) -> (i32, i32) {
    %c0_i32 = arith.constant 0 : i32
    %c0_i32_0 = arith.constant 0 : i32
    return %c0_i32, %arg1 : i32, i32
  }
  func.func @transform_3(%arg0: i32, %arg1: i32, %arg2: i32, %arg3: i32) -> (i32, i32) {
    %c0_i32 = arith.constant 0 : i32
    %c0_i32_0 = arith.constant 0 : i32
    return %c0_i32, %arg1 : i32, i32
  }
  func.func @transform_4(%arg0: i32, %arg1: i32, %arg2: i32, %arg3: i32) -> (i32, i32, i32) {
    %0 = arith.muli %arg2, %arg3 : i32
    %c0_i32 = arith.constant 0 : i32
    return %arg0, %0, %arg1 : i32, i32, i32
  }
}

</mosaic_0001>

<bundles_post_ra>
// kernel: tpu_custom_call.1
= control target key start
LH: loop header
LB: loop body
LE: loop exit
PB: predicated region body
PF: predicated region fallthrough
CT: control target
= control target key end

     0   :  { %s1643_s0 = inlined_call_operand.hbm [shape: bf16[2,64,128], index: 0, kind: input, shape index: {}]   ;;  %s1644_s1 = inlined_call_operand.hbm [shape: bf16[128,128], index: 1, kind: input, shape index: {}]   ;;  %s1645_s2 = inlined_call_operand.hbm [shape: f32[1,128], index: 2, kind: input, shape index: {}]   ;;  %s1646_s3 = inlined_call_operand.hbm [shape: f32[1,128], index: 3, kind: input, shape index: {}]   ;;  %s1647_s4 = inlined_call_operand.hbm [shape: f32[2,64,128], index: 4, kind: output, shape index: {}]  }
   0x1   :  { %1667 = sst [smem:[#allocation31_spill]] %s1644_s1 }
   0x2   :  { %1668 = sst [smem:[#allocation32_spill]] %s1645_s2 }
   0x3   :  { %1669 = sst [smem:[#allocation33_spill]] %s1646_s3 }
   0x4   :  { %1670 = sst [smem:[#allocation34_spill]] %s1647_s4 }
   0x5   :  { %9 = vsyncpa [#allocation8], 0 }
   0x6   :  { %11 = vsyncpa [#allocation8 + $0x1], 0 }
   0x7   :  { %12 = vsyncpa [#allocation11], 0 }
   0x8   :  { %13 = vsyncpa [#allocation14], 0 }
   0x9   :  { %14 = vsyncpa [#allocation9], 0 }
   0xa   :  { %16 = vsyncpa [#allocation9 + $0x1], 0  ;;  %s1258_s15 = smov 0   ;;  %s1260_s16 = smov 0  }
   0xb   :  { %s1262_s17 = smov 0   ;;  %s1264_s18 = smov 0  }
   0xc   :  { %s1266_s19 = smov 0   ;;  %s1268_s20 = smov 0  }
   0xd   :  { %s1270_s21 = smov 0   ;;  %s1272_s22 = smov 0  }
   0xe   :  { %s1274_s23 = smov 0   ;;  %s1276_s24 = smov 0  }
   0xf   :  { %s1278_s25 = smov 0   ;;  %s1280_s26 = smov 0  }
  0x10   :  { %s1282_s27 = smov 0  }
  0x11 LB: > { %1671 = sst [smem:[#allocation20_spill]] %s1173_s15  ;;  %s724_s28 = sadd.s32 4294967295, %s1221_s27   ;;  %s1221_s27 = sphi %s1282_s27, %s22_s27   ;;  %s1217_s26 = sphi %s1280_s26, %s1731_s26   ;;  %s1213_s25 = sphi %s1278_s25, %s1730_s25   ;;  %s1209_s24 = sphi %s1276_s24, %s1721_s24   ;;  %s1205_s23 = sphi %s1274_s23, %s1729_s23   ;;  %s1201_s22 = sphi %s1272_s22, %s1720_s22   ;;  %s1197_s21 = sphi %s1270_s21, %s1728_s21   ;;  %s1193_s20 = sphi %s1268_s20, %s1727_s20   ;;  %s1189_s19 = sphi %s1266_s19, %s1726_s19   ;;  %s1185_s18 = sphi %s1264_s18, %s1725_s18   ;;  %s1181_s17 = sphi %s1262_s17, %s1724_s17   ;;  %s1177_s16 = sphi %s1260_s16, %s1723_s16   ;;  %s1173_s15 = sphi %s1258_s15, %s1718_s15  }
  0x12   : > { %1672 = sst [smem:[#allocation21_spill]] %s1177_s16  ;;  %s725_s29 = sadd.s32 4294967294, %s1221_s27  }
  0x13   : > { %1673 = sst [smem:[#allocation22_spill]] %s1197_s21  ;;  %p76_p0 = scmp.ne.s32.totalorder %s1189_s19, %s1185_s18 }
  0x14   : > { %1674 = sst [smem:[#allocation23_spill]] %s1201_s22  ;;  %p1324_p1 = scmp.eq.s32.totalorder %s724_s28, 0 }
  0x15   : > { %1675 = sst [smem:[#allocation24_spill]] %s1205_s23  ;;  %p183_p2 = scmp.ne.s32.totalorder %s1181_s17, %s1177_s16 }
  0x16   : > { %1676 = sst [smem:[#allocation25_spill]] %s1209_s24  ;;  %p184_p3 = scmp.eq.s32.totalorder %s724_s28, 7 }
  0x17   : > { %1677 = sst [smem:[#allocation26_spill]] %s1213_s25  ;;  %p1332_p4 = por %p1324_p1, %p76_p0 }
  0x18   : > { %s1678_s30 = scalar_select %p1324_p1, 1, 0 }
  0x19   : > { %s1680_s5 = scalar_select %p1332_p4, 1, 0 }
  0x1a   : > { %1679 = sst [smem:[#allocation27_spill]] %s1678_s30  ;;  %p189_p5 = scmp.ne.s32.totalorder %s1177_s16, %s1173_s15 }
  0x1b   : > { %p1338_p6 = por %p184_p3, %p183_p2  ;;  %p190_p7 = scmp.eq.s32.totalorder %s725_s29, 7 }
  0x1c   : > { %p726_p8 = scmp.ge.s32.totalorder %s1221_s27, 1  ;;  %p197_p9 = scmp.lt.s32.totalorder %s1221_s27, 9 }
  0x1d   : > { %s1681_s6 = scalar_select %p1338_p6, 1, 0 }
  0x1e   : > { %p1344_p10 = por %p190_p7, %p189_p5  ;;  %p1348_p11 = pnand %p726_p8, %p197_p9 }
  0x1f   : > { %1682 = sst [smem:[#allocation28_spill]] %s1681_s6  ;;  %s1223_s9 = smov [#allocation10]  }
  0x20   : > { %s1683_s7 = scalar_select %p1344_p10, 1, 0 }
  0x21   : > { %s1685_s8 = scalar_select %p1348_p11, 1, 0 }
  0x22   : > { %1684 = sst [smem:[#allocation29_spill]] %s1683_s7  ;;  %s211_s10 = sshll.u32 %s1223_s9, 4  ;;  %s212_s10 = int_to_ptr.vmem [resolvable:$true] %s211_s10 }
  0x23   : > { %p811_p12 = pneg %p1348_p11  ;;  %s1224_s12 = smov [#allocation12]  }
  0x24   : > { %s227_s13 = sshll.u32 %s1224_s12, 4  ;;  %s1687_s1 = sld [smem:[#allocation31_spill]]  ;;  %s1360_s13 = int_to_ptr.vmem [resolvable:$true] %s227_s13 }
  0x25   : > { %p1356_p13 = pnand %p811_p12, %p1324_p1 }
  0x27   : > { %p1370_p2 = pneg %p1356_p13 }
  0x2a   : > { %s961_s28 = scalar_lea.hbm %s1687_s1, 1024 }
  0x2b   : > { %p962_p0 = scmp.ne.s32.totalorder %s1687_s1, %s961_s28  ;;  %p968_p7 = scmp.lt.u32.totalorder %s961_s28, %s1687_s1 }
  0x2d   : > { %p964_p3 = pnand %p1370_p2, %p962_p0 }
  0x2f   : > { %p965_p5 = pneg %p964_p3 }
  0x31   : > { %p970_p8 = pnand %p968_p7, %p965_p5 }
  0x33   : > { %973 = shalt.err (!%p970_p8)
}
  0x34   : > { %s974_s14 = scalar_lea.vmem %s212_s10, 1024  ;;  %p982_p6 = scmp.lt.s32.totalorder %s212_s10, %s212_s10 }
  0x35   : > { %p975_p9 = scmp.ne.s32.totalorder %s212_s10, %s974_s14  ;;  %p983_p1 = scmp.lt.s32.totalorder %s974_s14, %s974_s14 }
  0x37   : > { %p977_p12 = pnand %p975_p9, %p1370_p2  ;;  %p984_p4 = por %p983_p1, %p982_p6 }
  0x39   : > { %p978_p10 = pneg %p977_p12 }
  0x3b   : > { %p985_p11 = pnand %p984_p4, %p978_p10 }
  0x3d   : > { %988 = shalt.err (!%p985_p11)
}
  0x3e   : > { %s1658_s7 = smov 64   ;;  %s1659_s18 = smov 4  }
  0x3f   : > { %814 = dma.hbm_to_vmem [thread:$0]  (!%p1356_p13), %s1687_s1, 1024, %s212_s10, [#allocation11], %s1658_s7, %s1658_s7, %s1659_s18  }
  0x40   : > { %s1689_s2 = sld [smem:[#allocation32_spill]] }
  0x46   : > { %s989_s4 = scalar_lea.hbm %s1689_s2, 16 }
  0x47   : > { %p990_p1 = scmp.ne.s32.totalorder %s1689_s2, %s989_s4  ;;  %p996_p10 = scmp.lt.u32.totalorder %s989_s4, %s1689_s2 }
  0x49   : > { %p992_p4 = pnand %p990_p1, %p1370_p2 }
  0x4b   : > { %p993_p6 = pneg %p992_p4 }
  0x4d   : > { %p998_p11 = pnand %p996_p10, %p993_p6 }
  0x4f   : > { %1001 = shalt.err (!%p998_p11)
}
  0x50   : > { %s1002_s10 = scalar_lea.vmem %s1360_s13, 16  ;;  %s1009_s6 = scalar_lea.vmem %s1360_s13, 32 }
  0x51   : > { %p1003_p0 = scmp.ne.s32.totalorder %s1360_s13, %s1002_s10  ;;  %p1010_p7 = scmp.lt.s32.totalorder %s1360_s13, %s1360_s13 }
  0x52   : > { %p1011_p8 = scmp.lt.s32.totalorder %s1009_s6, %s1002_s10 }
  0x53   : > { %p1005_p3 = pnand %p1003_p0, %p1370_p2 }
  0x54   : > { %p1012_p9 = por %p1011_p8, %p1010_p7 }
  0x55   : > { %p1006_p5 = pneg %p1005_p3 }
  0x57   : > { %p1013_p12 = pnand %p1012_p9, %p1006_p5 }
  0x59   : > { %1016 = shalt.err (!%p1013_p12)
}
  0x5a   : > { %817 = dma.hbm_to_vmem [thread:$0]  (!%p1356_p13), %s1689_s2, 16, %s1360_s13, [#allocation11]  }
  0x5b   : > { %s1227_s23 = smov [#allocation13]   ;;  %s1690_s3 = sld [smem:[#allocation33_spill]] }
  0x5c   : > { %s240_s15 = sshll.u32 %s1227_s23, 4  ;;  %s241_s15 = int_to_ptr.vmem [resolvable:$true] %s240_s15 }
  0x61   : > { %s1017_s12 = scalar_lea.hbm %s1690_s3, 16 }
  0x62   : > { %p1018_p1 = scmp.ne.s32.totalorder %s1690_s3, %s1017_s12  ;;  %p1024_p10 = scmp.lt.u32.totalorder %s1017_s12, %s1690_s3 }
  0x64   : > { %p1020_p4 = pnand %p1018_p1, %p1370_p2 }
  0x66   : > { %p1021_p6 = pneg %p1020_p4 }
  0x68   : > { %p1026_p11 = pnand %p1024_p10, %p1021_p6 }
  0x6a   : > { %1029 = shalt.err (!%p1026_p11)
}
  0x6b   : > { %s1030_s13 = scalar_lea.vmem %s241_s15, 16  ;;  %s1037_s4 = scalar_lea.vmem %s241_s15, 32 }
  0x6c   : > { %p1031_p0 = scmp.ne.s32.totalorder %s241_s15, %s1030_s13  ;;  %p1038_p7 = scmp.lt.s32.totalorder %s241_s15, %s241_s15 }
  0x6d   : > { %p1039_p8 = scmp.lt.s32.totalorder %s1037_s4, %s1030_s13 }
  0x6e   : > { %p1033_p3 = pnand %p1031_p0, %p1370_p2 }
  0x6f   : > { %p1040_p9 = por %p1039_p8, %p1038_p7 }
  0x70   : > { %p1034_p5 = pneg %p1033_p3 }
  0x72   : > { %p1041_p12 = pnand %p1040_p9, %p1034_p5 }
  0x74   : > { %1044 = shalt.err (!%p1041_p12)
}
  0x75   : > { %820 = dma.hbm_to_vmem [thread:$0]  (!%p1356_p13), %s1690_s3, 16, %s241_s15, [#allocation14]  }
  0x76   : > { %s37_s9 = sadd.s32 1, %s1209_s24  ;;  %s40_s11 = sadd.s32 1, %s1213_s25 }
  0x77   : > { %p38_p2 = scmp.ge.s32.totalorder %s37_s9, 2  ;;  %s48_s7 = sadd.s32 1, %s1217_s26 }
  0x78   : > { %s52_s28 = ssub.s32 1, %s1213_s25  ;;  %s63_s29 = sadd.s32 1, %s1193_s20 }
  0x79   : > { %s1733_s9 = smov (%p38_p2, %s37_s9), 0  ;;  %s1735_s11 = smov (!%p38_p2, %s40_s11), %s1213_s25 }
  0x7a   : > { %1691 = sst [smem:[#allocation30_spill]] %s1733_s9  ;;  %s53_s12 = smul.u32 %s1209_s24, %s52_s28 }
  0x7b   : > { %p70_p1 = scmp.ne.s32.totalorder %s1193_s20, %s1189_s19  ;;  %p42_p4 = scmp.ge.s32.totalorder %s1735_s11, 2 }
  0x7c   : > { %p71_p6 = scmp.eq.s32.totalorder %s1221_s27, 0  ;;  %s1444_s14 = sadd.s32 %s1213_s25, %s53_s12 }
  0x7d   : > { %s164_s15 = smul.u32 %s1209_s24, %s1213_s25  ;;  %s1737_s11 = smov (%p42_p4, %s1735_s11), 0 }
  0x7e   : > { %s1739_s7 = smov (!%p42_p4, %s48_s7), %s1217_s26  ;;  %s55_s10 = ssub.s32 1, %s1737_s11 }
  0x7f   : > { %p1452_p13 = por %p71_p6, %p70_p1  ;;  %p50_p10 = scmp.ge.s32.totalorder %s1739_s7, 2 }
  0x80   : > { %s56_s13 = smul.u32 %s55_s10, %s1733_s9  ;;  %s173_s21 = sadd.s32 1, %s1181_s17 }
  0x81   : > { %s165_s4 = smul.u32 %s1737_s11, %s1733_s9  ;;  %s1741_s7 = smov (%p50_p10, %s1739_s7), 0 }
  0x82   : > { %s57_s23 = sadd.s32 %s56_s13, %s1737_s11  ;;  %s58_s12 = ssub.s32 %s1217_s26, %s1741_s7 }
  0x83   : > { %s167_s28 = ssub.s32 %s164_s15, %s165_s4  ;;  %s59_s18 = ssub.s32 %s1444_s14, %s57_s23 }
  0x84   : > { %s60_s1 = sor.u32 %s59_s18, %s58_s12  ;;  %s168_s2 = sor.u32 %s167_s28, %s58_s12 }
  0x85   : > { %p61_p11 = scmp.eq.s32.totalorder %s60_s1, 0  ;;  %p171_p0 = scmp.eq.s32.totalorder %s168_s2, 0 }
  0x86   : > { %p832_p3 = scmp.lt.s32.totalorder %s1221_s27, 8  ;;  %s251_s3 = sand.u32 1, %s1193_s20  }
  0x87   : > { %s1469_s25 = scalar_select %p61_p11, %s1193_s20, %s63_s29  }
  0x88   : > { %s1472_s10 = scalar_select %p171_p0, %s1181_s17, %s173_s21  }
  0x89   : > { %s731_s9 = sshll.u32 %s251_s3, 4  ;;  %s732_s24 = sshll.u32 %s1444_s14, 2 }
  0x8a   : > { %s733_s22 = sshll.u32 %s1217_s26, 3  ;;  %s255_s16 = scalar_lea.vmem [#allocation7], %s731_s9 }
  0x8b   : > { %s267_s30 = sshll.u32 %s255_s16, 4  ;;  %s264_s13 = sadd.s32 %s733_s22, %s732_s24  ;;  %s1476_s30 = int_to_ptr.vmem [resolvable:$true] %s267_s30 }
  0x8c   : > { %s734_s15 = sshll.u32 %s264_s13, 6  ;;  %p1480_p5 = pnand %p832_p3, %p1452_p13 }
  0x8d   : > { %s1487_s29 = scalar_lea.hbm %s1643_s0, %s734_s15  ;;  %s1489_s16 = scalar_lea.sflag [#allocation8], %s251_s3 }
  0x8e   : > { %s1045_s22 = scalar_lea.hbm %s1487_s29, 256  ;;  %p1047_p8 = pneg %p1480_p5 }
  0x8f   : > { %p1046_p7 = scmp.ne.s32.totalorder %s1487_s29, %s1045_s22  ;;  %s1050_s14 = scalar_lea.hbm %s1643_s0, 1024 }
  0x90   : > { %p1051_p2 = scmp.lt.u32.totalorder %s1487_s29, %s1643_s0  ;;  %p1052_p1 = scmp.lt.u32.totalorder %s1050_s14, %s1045_s22 }
  0x91   : > { %p1048_p9 = pnand %p1047_p8, %p1046_p7  ;;  %p1054_p6 = scmp.lt.u32.totalorder %s1045_s22, %s1487_s29 }
  0x92   : > { %p1053_p4 = por %p1052_p1, %p1051_p2 }
  0x93   : > { %p1049_p12 = pneg %p1048_p9 }
  0x94   : > { %p1055_p13 = por %p1054_p6, %p1053_p4 }
  0x96   : > { %p1056_p10 = pnand %p1055_p13, %p1049_p12 }
  0x98   : > { %1059 = shalt.err (!%p1056_p10)
}
  0x99   : > { %s1060_s3 = scalar_lea.vmem %s1476_s30, 256  ;;  %s1228_s21 = smov [#allocation7]  }
  0x9a   : > { %p1061_p11 = scmp.ne.s32.totalorder %s1476_s30, %s1060_s3  ;;  %s1065_s23 = sshll.u32 %s1228_s21, 4  ;;  %s1066_s23 = int_to_ptr.vmem [resolvable:$false] %s1065_s23 }
  0x9b   : > { %s1067_s28 = scalar_lea.vmem %s1066_s23, 512  ;;  %p1068_p7 = scmp.lt.s32.totalorder %s1476_s30, %s1066_s23 }
  0x9c   : > { %p1063_p0 = pnand %p1061_p11, %p1047_p8  ;;  %p1069_p9 = scmp.lt.s32.totalorder %s1067_s28, %s1060_s3 }
  0x9e   : > { %p1064_p3 = pneg %p1063_p0  ;;  %p1070_p2 = por %p1069_p9, %p1068_p7 }
  0xa0   : > { %p1071_p1 = pnand %p1070_p2, %p1064_p3 }
  0xa2   : > { %1074 = shalt.err (!%p1071_p1)
}
  0xa3   : > { %s1694_s12 = smov 4   ;;  %s1695_s13 = smov 64  }
  0xa4   : > { %824 = dma.hbm_to_vmem [thread:$0]  (!%p1480_p5), %s1487_s29, 256, %s1476_s30, %s1489_s16, %s1695_s13, %s1695_s13, %s1694_s12  }
  0xa5   : > { %p1696_p8 = scmp.ne.s32.totalorder %s1685_s8, 0 }
  0xa6   : > { %s281_s15 = sand.u32 (!%p1696_p8), 1, %s1189_s19   ;;  %p1697_p12 = scmp.ne.s32.totalorder (!%p1696_p8), %s1680_s5, 0 }
  0xa7   : > { %279 = sbr.rel (%p1696_p8) target bundleno = 572 (0x23c), region = 36  ;;  %s1523_s1 = sshll.u32 (!%p1696_p8), %s281_s15, 4 }
  0xa8   : > { %s282_s2 = scalar_lea.sflag (!%p1696_p8), [#allocation8], %s281_s15  ;;  %s285_s22 = scalar_lea.vmem (!%p1696_p8), [#allocation7], %s1523_s1 }
  0xae   : > { %1156 = dma.done.wait (%p1697_p12), %s282_s2, 256  }
  0xaf   : > { %1158 = vsyncadd (%p1697_p12), %s282_s2, 4294967040  ;;  %s1698_s18 = sld [smem:[#allocation27_spill]] }
  0xb5   : > { %p1699_p4 = scmp.ne.s32.totalorder %s1698_s18, 0 }
  0xb7   : > { %1160 = dma.done.wait (%p1699_p4), [#allocation11], 1040  }
  0xb8   : > { %1162 = vsyncadd (%p1699_p4), [#allocation11], 4294966256 }
  0xb9   : > { %1164 = dma.done.wait (%p1699_p4), [#allocation14], 16  }
  0xba   : > { %1166 = vsyncadd (%p1699_p4), [#allocation14], 4294967280  ;;  %s1700_s30 = sld [smem:[#allocation21_spill]]  ;;  %s1701_s5 = sld [smem:[#allocation23_spill]] }
  0xc0   : > { %s319_s8 = sand.u32 1, %s1700_s30   ;;  %p741_p5 = scmp.ne.s32.totalorder %s1701_s5, 0 }
  0xc1   : > { %s740_s29 = sshll.u32 %s319_s8, 5  ;;  %s1702_s24 = sld [smem:[#allocation22_spill]] (!%p741_p5) }
  0xc2   : > { %s1541_s16 = scalar_lea.vmem [#allocation15], %s740_s29  ;;  %332 = sbr.rel (%p741_p5) target bundleno = 479 (0x1df), region = 56 }
  0xc7   : > { %p742_p6 = scmp.ne.s32.totalorder (!%p741_p5), %s1702_s24, 0 }
  0xc9   : > { %336 = sbr.rel (%p742_p6) target bundleno = 208 (0xd0), region = 60  ;;  %v1229_v0 = vmov (!%p742_p6), 0.0  }
  0xca   : > { %337 = vst [vmem:[#allocation3] sm:$0x1] (!%p742_p6), %v1229_v0  ;;  %338 = vst [vmem:[#allocation4] sm:$0x1] (!%p742_p6), %v1229_v0 }
  0xd0 PF: > { %v949_v1 = vld [vmem:[#allocation10] sm:$0xff]   ;;  %v950_v2 = vld [vmem:[#allocation10 + $0x8] sm:$0xff]   ;;  %v951_v3 = vld [vmem:[#allocation10 + $0x10] sm:$0xff]   ;;  %s1703_s9 = sld [smem:[#allocation22_spill]] }
  0xd1   : > { %775 = vmatprep.subr.bf16.mxu0 %v949_v1  ;;  %v952_v4 = vld [vmem:[#allocation10 + $0x18] sm:$0xff]   ;;  %v957_v5 = vld [vmem:[%s285_s22] sm:$0xff]   ;;  %v954_v7 = vld [vmem:[#allocation10 + $0x28] sm:$0xff]  }
  0xd2   : > { %776 = vmatpush3.bf16.msra.mxu0 %v949_v1  ;;  %791 = vmatprep.mubr.bf16.mxu0 %v957_v5  ;;  %v953_v6 = vld [vmem:[#allocation10 + $0x20] sm:$0xff]   ;;  %v955_v8 = vld [vmem:[#allocation10 + $0x30] sm:$0xff]   ;;  %v956_v9 = vld [vmem:[#allocation10 + $0x38] sm:$0xff]  }
  0xd3   : > { %777 = vmatprep.subr.bf16.mxu0 %v950_v2  ;;  %v958_v10 = vld [vmem:[%s285_s22 + $0x8] sm:$0xff]  }
  0xd4   : > { %v474_v34 = vld [vmem:[#allocation3] sm:$0x1]  ;;  %v486_v37 = vld [vmem:[#allocation4] sm:$0x1] }
  0xd6   : > { %778 = vmatpush3.bf16.msra.mxu0 %v950_v2  ;;  %s753_s14 = sshll.u32 %s1703_s9, 5 }
  0xd7   : > { %779 = vmatprep.subr.bf16.mxu0 %v951_v3  ;;  %s469_s6 = scalar_lea.vmem [#allocation2], %s753_s14 }
  0xda   : > { %780 = vmatpush3.bf16.msra.mxu0 %v951_v3 }
  0xdb   : > { %781 = vmatprep.subr.bf16.mxu0 %v952_v4 }
  0xde   : > { %782 = vmatpush3.bf16.msra.mxu0 %v952_v4 }
  0xdf   : > { %783 = vmatprep.subr.bf16.mxu0 %v953_v6 }
  0xe2   : > { %784 = vmatpush3.bf16.msra.mxu0 %v953_v6 }
  0xe3   : > { %785 = vmatprep.subr.bf16.mxu0 %v954_v7 }
  0xe6   : > { %786 = vmatpush3.bf16.msra.mxu0 %v954_v7 }
  0xe7   : > { %787 = vmatprep.subr.bf16.mxu0 %v955_v8 }
  0xea   : > { %788 = vmatpush3.bf16.msra.mxu0 %v955_v8 }
  0xeb   : > { %789 = vmatprep.subr.bf16.mxu0 %v956_v9 }
  0xee   : > { %790 = vmatpush3.bf16.msra.mxu0 %v956_v9 }
  0xf1   : > { %792 = vmatmul.mubr.bf16.vlgmr.msra.gmra.mrb[0].mxu0 %v958_v10 }
 0x1c4   : > { %v793_v11 = vpop.f32.mrb[0].mxu0 }
 0x1c5   : > { %472 = vst [vmem:[%s469_s6 + $0x10] sm:$0xff] %v793_v11  ;;  %v453_v12 = vpop.f32.mrb[1].mxu0  ;;  %v489_v18 = vmul.f32 %v793_v11, %v793_v11 }
 0x1c6   : > { %470 = vst [vmem:[%s469_s6] sm:$0xff] %v453_v12  ;;  %v794_v13 = vpop.f32.mrb[2].mxu0  ;;  %v487_v15 = vmul.f32 %v453_v12, %v453_v12 }
 0x1c7   : > { %473 = vst [vmem:[%s469_s6 + $0x18] sm:$0xff] %v794_v13  ;;  %v456_v14 = vpop.f32.mrb[3].mxu0  ;;  %v490_v21 = vmul.f32 %v794_v13, %v794_v13 }
 0x1c8   : > { %471 = vst [vmem:[%s469_s6 + $0x8] sm:$0xff] %v456_v14  ;;  %v475_v16 = vadd.f32 %v456_v14, %v453_v12  ;;  %v488_v17 = vmul.f32 %v456_v14, %v456_v14 }
 0x1ca   : > { %v476_v19 = vadd.f32 %v793_v11, %v475_v16  ;;  %v491_v20 = vadd.f32 %v488_v17, %v487_v15 }
 0x1cc   : > { %v477_v22 = vadd.f32 %v794_v13, %v476_v19  ;;  %v492_v23 = vadd.f32 %v491_v20, %v489_v18 }
 0x1ce   : > { %v478_v24 = vrot.slane %v477_v22, 4  ;;  %v493_v25 = vadd.f32 %v492_v23, %v490_v21 }
 0x1d0   : > { %v479_v26 = vadd.f32 %v478_v24, %v477_v22  ;;  %v494_v27 = vrot.slane %v493_v25, 4 }
 0x1d2   : > { %v480_v28 = vrot.slane %v479_v26, 2  ;;  %v495_v29 = vadd.f32 %v494_v27, %v493_v25 }
 0x1d4   : > { %v481_v30 = vadd.f32 %v480_v28, %v479_v26  ;;  %v496_v31 = vrot.slane %v495_v29, 2 }
 0x1d6   : > { %v482_v32 = vrot.slane %v481_v30, 1  ;;  %v497_v33 = vadd.f32 %v496_v31, %v495_v29 }
 0x1d8   : > { %v483_v35 = vadd.f32 %v482_v32, %v481_v30  ;;  %v498_v36 = vrot.slane %v497_v33, 1 }
 0x1da   : > { %v484_v38 = vadd.f32 %v483_v35, %v474_v34  ;;  %v499_v39 = vadd.f32 %v498_v36, %v497_v33 }
 0x1dc   : > { %485 = vst [vmem:[#allocation3] sm:$0x1] %v484_v38  ;;  %v500_v40 = vadd.f32 %v499_v39, %v486_v37 }
 0x1de   : > { %501 = vst [vmem:[#allocation4] sm:$0x1] %v500_v40 }
 0x1df PF: > { %s1704_s4 = sld [smem:[#allocation23_spill]] }
 0x1e5   : > { %p754_p13 = scmp.ne.s32.totalorder %s1704_s4, 1 }
 0x1e6   : > { %s1705_s3 = sld [smem:[#allocation22_spill]] (!%p754_p13) }
 0x1e7   : > { %505 = sbr.rel (%p754_p13) target bundleno = 542 (0x21e), region = 64 }
 0x1ec   : > { %p755_p10 = scmp.ne.s32.totalorder (!%p754_p13), %s1705_s3, 0 }
 0x1ee   : > { %509 = sbr.rel (%p755_p10) target bundleno = 523 (0x20b), region = 68  ;;  %v510_v41 = vld [vmem:[#allocation3] sm:$0x1] (!%p755_p10)  ;;  %v512_v42 = vld [vmem:[#allocation4] sm:$0x1] (!%p755_p10) }
 0x1ef   : > { %v511_v43 = vmul.f32 (!%p755_p10), 0.015625, %v510_v41  ;;  %v513_v44 = vmul.f32 (!%p755_p10), 0.015625, %v512_v42  ;;  %v517_v49 = vld [vmem:[#allocation12] sm:$0x1] (!%p755_p10)  ;;  %v522_v52 = vld [vmem:[#allocation13] sm:$0x1] (!%p755_p10) }
 0x1f1   : > { %v514_v45 = vmul.f32 (!%p755_p10), %v511_v43, %v511_v43 }
 0x1f3   : > { %v515_v46 = vsub.f32 (!%p755_p10), %v513_v44, %v514_v45 }
 0x1f5   : > { %v516_v47 = vmax.f32 %v515_v46, 0.0 }
 0x1f7   : > { %v518_v48 = vadd.f32 1e-05, %v516_v47 }
 0x1f9   : > { %959 = vrsqrt.f32 %v518_v48 }
 0x203   : > { %v960_v50 = vpop.eup %959 }
 0x204   : > { %v520_v51 = vmul.f32 %v960_v50, %v517_v49 }
 0x206   : > { %521 = vst [vmem:[#allocation5] sm:$0x1] %v520_v51  ;;  %v523_v53 = vmul.f32 %v520_v51, %v511_v43 }
 0x208   : > { %v524_v54 = vsub.f32 %v522_v52, %v523_v53 }
 0x20a   : > { %525 = vst [vmem:[#allocation6] sm:$0x1] %v524_v54 }
 0x20b PF: > { %s1706_s21 = sld [smem:[#allocation22_spill]] }
 0x20d   : > { %v757_v55 = vld [vmem:[#allocation5] ss:$0 sm:$0xff] }
 0x211   : > { %s756_s23 = sshll.u32 %s1706_s21, 5  ;;  %v758_v56 = vld [vmem:[#allocation6] ss:$0 sm:$0xff] }
 0x212   : > { %s527_s28 = scalar_lea.vmem [#allocation2], %s756_s23 }
 0x213   : > { %v528_v57 = vld [vmem:[%s527_s28] sm:$0xff]  ;;  %v529_v58 = vld [vmem:[%s527_s28 + $0x8] sm:$0xff]  ;;  %v530_v59 = vld [vmem:[%s527_s28 + $0x10] sm:$0xff] }
 0x214   : > { %v539_v60 = vmul.f32 %v757_v55, %v528_v57  ;;  %v540_v61 = vmul.f32 %v757_v55, %v529_v58  ;;  %v541_v62 = vmul.f32 %v757_v55, %v530_v59  ;;  %v531_v63 = vld [vmem:[%s527_s28 + $0x18] sm:$0xff] }
 0x215   : > { %v542_v0 = vmul.f32 %v757_v55, %v531_v63 }
 0x216   : > { %v550_v1 = vadd.f32 %v758_v56, %v539_v60  ;;  %v551_v2 = vadd.f32 %v758_v56, %v540_v61  ;;  %v552_v3 = vadd.f32 %v758_v56, %v541_v62 }
 0x217   : > { %v553_v4 = vadd.f32 %v758_v56, %v542_v0 }
 0x218   : > { %v554_v5 = vmul.f32 0.2, %v550_v1  ;;  %v555_v6 = vmul.f32 0.2, %v551_v2  ;;  %v556_v7 = vmul.f32 0.2, %v552_v3 }
 0x219   : > { %v557_v8 = vmul.f32 0.2, %v553_v4 }
 0x21a   : > { %v558_v9 = vmax.f32 %v550_v1, %v554_v5  ;;  %v559_v10 = vmax.f32 %v551_v2, %v555_v6  ;;  %v560_v11 = vmax.f32 %v552_v3, %v556_v7 }
 0x21b   : > { %v561_v12 = vmax.f32 %v553_v4, %v557_v8 }
 0x21c   : > { %562 = vst [vmem:[%s1541_s16] sm:$0xff] %v558_v9  ;;  %563 = vst [vmem:[%s1541_s16 + $0x8] sm:$0xff] %v559_v10 }
 0x21d   : > { %564 = vst [vmem:[%s1541_s16 + $0x10] sm:$0xff] %v560_v11  ;;  %565 = vst [vmem:[%s1541_s16 + $0x18] sm:$0xff] %v561_v12 }
 0x21e PF: > { %s1707_s12 = sld [smem:[#allocation23_spill]]  ;;  %s1708_s13 = sld [smem:[#allocation22_spill]] }
 0x21f   : > { %s1709_s15 = sld [smem:[#allocation24_spill]]  ;;  %s1711_s2 = sld [smem:[#allocation28_spill]] }
 0x220   : > { %s584_s30 = sshll.u32 %s1541_s16, 4  ;;  %s1712_s6 = sld [smem:[#allocation34_spill]]  ;;  %s1561_s30 = int_to_ptr.vmem [resolvable:$true] %s584_s30 }
 0x221   : > { %s1570_s3 = scalar_lea.sflag [#allocation9], %s319_s8  ;;  %s1075_s21 = scalar_lea.vmem %s1561_s30, 512 }
 0x222   : > { %p1076_p11 = scmp.ne.s32.totalorder %s1561_s30, %s1075_s21  ;;  %s1230_s16 = smov [#allocation15]  }
 0x223   : > { %s1079_s23 = sshll.u32 %s1230_s16, 4  ;;  %s1080_s23 = int_to_ptr.vmem [resolvable:$false] %s1079_s23 }
 0x224   : > { %s574_s22 = smul.u32 %s1708_s13, %s1707_s12  ;;  %s1081_s28 = scalar_lea.vmem %s1080_s23, 1024 }
 0x225   : > { %s761_s18 = sshll.u32 %s1709_s15, 3  ;;  %p1713_p0 = scmp.ne.s32.totalorder %s1711_s2, 0 }
 0x226   : > { %s760_s29 = sshll.u32 %s574_s22, 2  ;;  %p1082_p9 = scmp.lt.s32.totalorder %s1561_s30, %s1080_s23 }
 0x227   : > { %s581_s5 = sadd.s32 %s761_s18, %s760_s29  ;;  %p1077_p3 = pnand %p1076_p11, %p1713_p0 }
 0x228   : > { %s762_s24 = sshll.u32 %s581_s5, 7  ;;  %p1083_p2 = scmp.lt.s32.totalorder %s1081_s28, %s1075_s21 }
 0x229   : > { %s1566_s4 = scalar_lea.hbm %s1712_s6, %s762_s24  ;;  %p1078_p7 = pneg %p1077_p3 }
 0x22a   : > { %p1084_p1 = por %p1083_p2, %p1082_p9 }
 0x22c   : > { %p1085_p8 = pnand %p1084_p1, %p1078_p7 }
 0x22e   : > { %1088 = shalt.err (!%p1085_p8)
}
 0x22f   : > { %s1089_s8 = scalar_lea.hbm %s1566_s4, 512  ;;  %s1093_s15 = scalar_lea.hbm %s1712_s6, 2048 }
 0x230   : > { %p1090_p12 = scmp.ne.s32.totalorder %s1566_s4, %s1089_s8  ;;  %p1094_p6 = scmp.lt.u32.totalorder %s1566_s4, %s1712_s6 }
 0x231   : > { %p1095_p13 = scmp.lt.u32.totalorder %s1093_s15, %s1089_s8  ;;  %p1097_p11 = scmp.lt.u32.totalorder %s1089_s8, %s1566_s4 }
 0x232   : > { %p1091_p4 = pnand %p1090_p12, %p1713_p0 }
 0x233   : > { %p1096_p10 = por %p1095_p13, %p1094_p6 }
 0x234   : > { %p1092_p5 = pneg %p1091_p4 }
 0x235   : > { %p1098_p3 = por %p1097_p11, %p1096_p10 }
 0x237   : > { %p1099_p7 = pnand %p1098_p3, %p1092_p5 }
 0x239   : > { %1102 = shalt.err (!%p1099_p7)
}
 0x23a   : > { %s1231_s18 = smov 128   ;;  %s1232_s29 = smov 8  }
 0x23b   : > { %809 = dma.vmem_to_hbm [thread:$0]  (%p1713_p0), %s1561_s30, 512, %s1566_s4, %s1570_s3, %s1231_s18, %s1231_s18, %s1232_s29  }
 0x23c PF: > { %s1714_s5 = sld [smem:[#allocation20_spill]]  ;;  %s1715_s24 = sld [smem:[#allocation29_spill]] }
 0x23d   : > { %p836_p9 = scmp.ge.s32.totalorder %s1221_s27, 2 }
 0x242   : > { %s599_s9 = sand.u32 1, %s1714_s5   ;;  %p1716_p2 = scmp.ne.s32.totalorder %s1715_s24, 0 }
 0x243   : > { %s600_s14 = scalar_lea.sflag [#allocation9], %s599_s9 }
 0x244   : > { %p826_p1 = pnand %p836_p9, %p1716_p2 }
 0x246   : > { %1168 = dma.done.wait (!%p826_p1), %s600_s14, 512  }
 0x247   : > { %1170 = vsyncadd (!%p826_p1), %s600_s14, 4294966784  ;;  %s22_s27 = sadd.s32 1, %s1221_s27   ;;  %s1718_s15 = sld [smem:[#allocation21_spill]] }
 0x248   : > { %p1599_p8 = scmp.ge.s32.totalorder %s22_s27, 10   ;;  %s1719_s2 = sld [smem:[#allocation25_spill]] }
 0x249   : > { %s1720_s22 = sld [smem:[#allocation26_spill]]  ;;  %s1721_s24 = sld [smem:[#allocation30_spill]] }
 0x24a   : > { %s1723_s16 = smov %s1181_s17  ;;  %s1724_s17 = smov %s1472_s10 }
 0x24b   : > { %s1725_s18 = smov %s1189_s19  ;;  %s1726_s19 = smov %s1193_s20 }
 0x24c   : > { %s1727_s20 = smov %s1469_s25  ;;  %s1729_s23 = smov %s1217_s26 }
 0x24d   : > { %s1730_s25 = smov %s1737_s11  ;;  %s1731_s26 = smov %s1741_s7 }
 0x24e   : > { %s1728_s21 = smov %s1719_s2  ;;  %21 = sbr.rel (!%p1599_p8) target bundleno = 17 (0x11), region = 114 }
 0x255   :  { %605 = vsyncpa [#allocation8], 1 }
 0x256   :  { %607 = vsyncpa [#allocation8 + $0x1], 1 }
 0x257   :  { %608 = vsyncpa [#allocation11], 1 }
 0x258   :  { %609 = vsyncpa [#allocation14], 1 }
 0x259   :  { %610 = vsyncpa [#allocation9], 1 }
 0x25a   :  { %612 = vsyncpa [#allocation9 + $0x1], 1 }

</bundles_post_ra>
